<compile_context>
chip_gen: v6e
topology: v6e:2x2x1
jax: 0.10.0
libtpu: 0.0.40
codegen_flags: <defaults>
</compile_context>

<pallas_src>
import jax
import jax.numpy as jnp
from jax.experimental import pallas as pl
from jax.experimental.pallas import tpu as pltpu


def _se_kernel(x_ref, w1_ref, b1_ref, w2_ref, b2_ref, o_ref):
    # x_ref: (NB, C, HW), w1_ref: (C, mid), b1_ref: (1, mid),
    # w2_ref: (mid, C), b2_ref: (1, C), o_ref: (NB, C, HW)
    x = x_ref[...].astype(jnp.float32)                     # (NB, C, HW), accumulate in f32

    # Global average pool over flattened spatial dims (== mean over H then W).
    pooled = jnp.mean(x, axis=-1)                          # (NB, C)

    # reduce (1x1 conv == FC) + ReLU, batched over the block.
    h = jnp.dot(pooled, w1_ref[...], preferred_element_type=jnp.float32) + b1_ref[...]
    h = jnp.maximum(h, 0.0)                                # (NB, mid)

    # expand (1x1 conv == FC) + Hardsigmoid: clip(z/6 + 0.5, 0, 1)
    z = jnp.dot(h, w2_ref[...], preferred_element_type=jnp.float32) + b2_ref[...]
    s = jnp.clip(z * (1.0 / 6.0) + 0.5, 0.0, 1.0)          # (NB, C)

    # Channel-wise rescale (scale broadcasts along the lane/HW axis).
    o_ref[...] = (x * s[:, :, None]).astype(o_ref.dtype)


def _pick_block_batch(N, per_sample_bytes, target_bytes=2 << 20):
    """Largest NB dividing N with NB*per_sample_bytes <= target, preferring >=2 grid steps."""
    max_nb = max(1, target_bytes // max(per_sample_bytes, 1))
    candidates = [nb for nb in range(1, N + 1) if N % nb == 0 and nb <= max_nb]
    if not candidates:
        return 1
    # Prefer leaving at least 2 grid steps so v7x's two TensorCores both get work.
    multi_step = [nb for nb in candidates if N // nb >= 2]
    return max(multi_step) if multi_step else max(candidates)


def se_forward(x, w1, b1, w2, b2):
    """x: (N, C, H, W). w1: (C, mid), b1: (mid,), w2: (mid, C), b2: (C,)."""
    N, C, H, W = x.shape
    mid = w1.shape[1]
    HW = H * W
    itemsize = jnp.dtype(x.dtype).itemsize

    x_flat = x.reshape(N, C, HW)
    b1_2d = b1.reshape(1, mid)
    b2_2d = b2.reshape(1, C)

    # Batch NB samples per grid step; each block ~<= 2 MiB.
    NB = _pick_block_batch(N, C * HW * itemsize)
    grid = (N // NB,)
    block_bytes = NB * C * HW * itemsize

    cost = pl.CostEstimate(
        flops=2 * N * (C * mid * 2 + C * HW),          # tiny FCs + rescale multiply
        transcendentals=0,
        bytes_accessed=2 * N * C * HW * itemsize       # x read + out write dominate
        + (C * mid + mid + mid * C + C) * 4,
    )

    out_flat = pl.pallas_call(
        _se_kernel,
        out_shape=jax.ShapeDtypeStruct((N, C, HW), x.dtype),
        grid=grid,
        in_specs=[
            pl.BlockSpec((NB, C, HW), lambda n: (n, 0, 0)),
            pl.BlockSpec((C, mid), lambda n: (0, 0)),
            pl.BlockSpec((1, mid), lambda n: (0, 0)),
            pl.BlockSpec((mid, C), lambda n: (0, 0)),
            pl.BlockSpec((1, C), lambda n: (0, 0)),
        ],
        out_specs=pl.BlockSpec((NB, C, HW), lambda n: (n, 0, 0)),
        compiler_params=pltpu.CompilerParams(
            dimension_semantics=("parallel",),
            # Explicit headroom: > v5e's 16 MiB default scope, < v7x's 64 MiB physical.
            vmem_limit_bytes=48 * 1024 * 1024,
        ),
        cost_estimate=cost,
    )(x_flat, w1, b1_2d, w2, b2_2d)

    return out_flat.reshape(N, C, H, W)


def se_reference(x, w1, b1, w2, b2):
    """Pure-JAX reference mirroring the PyTorch forward."""
    y = jnp.mean(x, axis=(2, 3), keepdims=True)                    # (N, C, 1, 1)
    yv = y[:, :, 0, 0]                                             # (N, C)
    h = jnp.maximum(yv @ w1 + b1, 0.0)                             # (N, mid)
    z = h @ w2 + b2                                                # (N, C)
    s = jnp.clip(z / 6.0 + 0.5, 0.0, 1.0)
    return x * s[:, :, None, None]


if __name__ == "__main__":
    # Small shapes consistent with the module: N=2, C=8 (REDUCTION=4 -> mid=2), H=W=16.
    N, C, H, W = 2, 8, 16, 16
    mid = C // 4

    key = jax.random.PRNGKey(0)
    kx, kw1, kb1, kw2, kb2 = jax.random.split(key, 5)

    x = jax.random.normal(kx, (N, C, H, W), dtype=jnp.float32)
    # PyTorch conv weights are (out, in, 1, 1); we store them transposed as (in, out)
    # FC matrices so the kernel computes pooled @ W without any in-kernel transposes.
    w1 = jax.random.normal(kw1, (C, mid), dtype=jnp.float32) * 0.1   # reduce: C -> mid
    b1 = jax.random.normal(kb1, (mid,), dtype=jnp.float32) * 0.1
    w2 = jax.random.normal(kw2, (mid, C), dtype=jnp.float32) * 0.1   # expand: mid -> C
    b2 = jax.random.normal(kb2, (C,), dtype=jnp.float32) * 0.1

    out = se_forward(x, w1, b1, w2, b2)
    jax.block_until_ready(out)

    ref = se_reference(x, w1, b1, w2, b2)
    assert out.shape == (N, C, H, W)
    assert jnp.allclose(out, ref, atol=1e-5, rtol=1e-5), "mismatch vs reference"

    print("KERNEL_OK")
</pallas_src>

<mosaic_0001>
module attributes {stable_mosaic.version = 11 : i64} {
  func.func @_se_kernel(%arg0: i32, %arg1: memref<1x8x256xf32, #tpu.memory_space<vmem>>, %arg2: memref<8x2xf32, #tpu.memory_space<vmem>>, %arg3: memref<1x2xf32, #tpu.memory_space<vmem>>, %arg4: memref<2x8xf32, #tpu.memory_space<vmem>>, %arg5: memref<1x8xf32, #tpu.memory_space<vmem>>, %arg6: memref<1x8x256xf32, #tpu.memory_space<vmem>>) attributes {dimension_semantics = [#tpu.dimension_semantics<parallel>], iteration_bounds = array<i64: 2>, scalar_prefetch = 0 : i64, scratch_operands = 0 : i64, tpu.core_type = #tpu.core_type<tc>, window_params = [{transform_indices = @transform_0, window_bounds = array<i64: 1, 8, 256>}, {pipeline_mode = #tpu.pipeline_mode<synchronous>, transform_indices = @transform_1, window_bounds = array<i64: 8, 2>}, {pipeline_mode = #tpu.pipeline_mode<synchronous>, transform_indices = @transform_2, window_bounds = array<i64: 1, 2>}, {pipeline_mode = #tpu.pipeline_mode<synchronous>, transform_indices = @transform_3, window_bounds = array<i64: 2, 8>}, {pipeline_mode = #tpu.pipeline_mode<synchronous>, transform_indices = @transform_4, window_bounds = array<i64: 1, 8>}, {transform_indices = @transform_5, window_bounds = array<i64: 1, 8, 256>}]} {
    %c0 = arith.constant 0 : index
    %c0_0 = arith.constant 0 : index
    %c0_1 = arith.constant 0 : index
    %0 = vector.load %arg1[%c0, %c0_0, %c0_1] : memref<1x8x256xf32, #tpu.memory_space<vmem>>, vector<1x8x256xf32>
    %cst = arith.constant dense<0.000000e+00> : vector<1x8xf32>
    %1 = vector.multi_reduction <add>, %0, %cst [2] : vector<1x8x256xf32> to vector<1x8xf32>
    %cst_2 = arith.constant 2.560000e+02 : f32
    %2 = vector.broadcast %cst_2 : f32 to vector<1x8xf32>
    %3 = arith.divf %1, %2 : vector<1x8xf32>
    %c0_3 = arith.constant 0 : index
    %c0_4 = arith.constant 0 : index
    %4 = vector.load %arg2[%c0_3, %c0_4] : memref<8x2xf32, #tpu.memory_space<vmem>>, vector<8x2xf32>
    %cst_5 = arith.constant dense<0.000000e+00> : vector<1x2xf32>
    %5 = tpu.matmul %3, %4, %cst_5 {dimension_numbers = #tpu.dot_dimension_numbers<[1], [0], [0], [1], [0, 0, 1, 1], [], []>} : vector<1x8xf32>, vector<8x2xf32>, vector<1x2xf32> -> vector<1x2xf32>
    %c0_6 = arith.constant 0 : index
    %c0_7 = arith.constant 0 : index
    %6 = vector.load %arg3[%c0_6, %c0_7] : memref<1x2xf32, #tpu.memory_space<vmem>>, vector<1x2xf32>
    %7 = arith.addf %5, %6 : vector<1x2xf32>
    %cst_8 = arith.constant 0.000000e+00 : f32
    %8 = vector.broadcast %cst_8 : f32 to vector<1x2xf32>
    %9 = arith.maximumf %7, %8 : vector<1x2xf32>
    %c0_9 = arith.constant 0 : index
    %c0_10 = arith.constant 0 : index
    %10 = vector.load %arg4[%c0_9, %c0_10] : memref<2x8xf32, #tpu.memory_space<vmem>>, vector<2x8xf32>
    %cst_11 = arith.constant dense<0.000000e+00> : vector<1x8xf32>
    %11 = tpu.matmul %9, %10, %cst_11 {dimension_numbers = #tpu.dot_dimension_numbers<[1], [0], [0], [1], [0, 0, 1, 1], [], []>} : vector<1x2xf32>, vector<2x8xf32>, vector<1x8xf32> -> vector<1x8xf32>
    %c0_12 = arith.constant 0 : index
    %c0_13 = arith.constant 0 : index
    %12 = vector.load %arg5[%c0_12, %c0_13] : memref<1x8xf32, #tpu.memory_space<vmem>>, vector<1x8xf32>
    %13 = arith.addf %11, %12 : vector<1x8xf32>
    %cst_14 = arith.constant 0.166666672 : f32
    %14 = vector.broadcast %cst_14 : f32 to vector<1x8xf32>
    %15 = arith.mulf %13, %14 : vector<1x8xf32>
    %cst_15 = arith.constant 5.000000e-01 : f32
    %16 = vector.broadcast %cst_15 : f32 to vector<1x8xf32>
    %17 = arith.addf %15, %16 : vector<1x8xf32>
    %cst_16 = arith.constant 0.000000e+00 : f32
    %cst_17 = arith.constant 1.000000e+00 : f32
    %18 = vector.broadcast %cst_16 : f32 to vector<1x8xf32>
    %19 = arith.maximumf %18, %17 : vector<1x8xf32>
    %20 = vector.broadcast %cst_17 : f32 to vector<1x8xf32>
    %21 = arith.minimumf %20, %19 : vector<1x8xf32>
    %22 = vector.shape_cast %21 : vector<1x8xf32> to vector<1x8x1xf32>
    %23 = vector.broadcast %22 : vector<1x8x1xf32> to vector<1x8x256xf32>
    %24 = arith.mulf %0, %23 : vector<1x8x256xf32>
    %c0_18 = arith.constant 0 : index
    %c0_19 = arith.constant 0 : index
    %c0_20 = arith.constant 0 : index
    %25 = vector.load %arg6[%c0_18, %c0_19, %c0_20] : memref<1x8x256xf32, #tpu.memory_space<vmem>>, vector<1x8x256xf32>
    tpu.vector_store %arg6[%c0_18, %c0_19, %c0_20], %24 {strides = array<i32>} : memref<1x8x256xf32, #tpu.memory_space<vmem>>, vector<1x8x256xf32>,
    return
  }
  func.func @transform_0(%arg0: i32) -> (i32, i32, i32) {
    %c0_i32 = arith.constant 0 : i32
    %c0_i32_0 = arith.constant 0 : i32
    %c0_i32_1 = arith.constant 0 : i32
    return %arg0, %c0_i32, %c0_i32_0 : i32, i32, i32
  }
  func.func @transform_1(%arg0: i32) -> (i32, i32) {
    %c0_i32 = arith.constant 0 : i32
    %c0_i32_0 = arith.constant 0 : i32
    %c0_i32_1 = arith.constant 0 : i32
    return %c0_i32, %c0_i32_0 : i32, i32
  }
  func.func @transform_2(%arg0: i32) -> (i32, i32) {
    %c0_i32 = arith.constant 0 : i32
    %c0_i32_0 = arith.constant 0 : i32
    %c0_i32_1 = arith.constant 0 : i32
    return %c0_i32, %c0_i32_0 : i32, i32
  }
  func.func @transform_3(%arg0: i32) -> (i32, i32) {
    %c0_i32 = arith.constant 0 : i32
    %c0_i32_0 = arith.constant 0 : i32
    %c0_i32_1 = arith.constant 0 : i32
    return %c0_i32, %c0_i32_0 : i32, i32
  }
  func.func @transform_4(%arg0: i32) -> (i32, i32) {
    %c0_i32 = arith.constant 0 : i32
    %c0_i32_0 = arith.constant 0 : i32
    %c0_i32_1 = arith.constant 0 : i32
    return %c0_i32, %c0_i32_0 : i32, i32
  }
  func.func @transform_5(%arg0: i32) -> (i32, i32, i32) {
    %c0_i32 = arith.constant 0 : i32
    %c0_i32_0 = arith.constant 0 : i32
    %c0_i32_1 = arith.constant 0 : i32
    return %arg0, %c0_i32, %c0_i32_0 : i32, i32, i32
  }
}

</mosaic_0001>

<bundles_post_ra>
// kernel: tpu_custom_call.1
= control target key start
LH: loop header
LB: loop body
LE: loop exit
PB: predicated region body
PF: predicated region fallthrough
CT: control target
= control target key end

     0   :  { %10 = vsyncpa [#allocation3], 0  ;;  %s883_s0 = inlined_call_operand.hbm [shape: f32[2,8,256], index: 0, kind: input, shape index: {}]   ;;  %s884_s1 = inlined_call_operand.vmem [shape: f32[8,2], index: 1, kind: input, shape index: {}]   ;;  %s885_s2 = inlined_call_operand.vmem [shape: f32[1,2], index: 2, kind: input, shape index: {}]   ;;  %s886_s3 = inlined_call_operand.vmem [shape: f32[2,8], index: 3, kind: input, shape index: {}]   ;;  %s887_s4 = inlined_call_operand.vmem [shape: f32[1,8], index: 4, kind: input, shape index: {}]   ;;  %s888_s5 = inlined_call_operand.hbm [shape: f32[2,8,256], index: 5, kind: output, shape index: {}]  }
   0x1   :  { %12 = vsyncpa [#allocation3 + $0x1], 0 }
   0x2   :  { %13 = vsyncpa [#allocation4], 0 }
   0x3   :  { %15 = vsyncpa [#allocation4 + $0x1], 0  ;;  %s720_s18 = smov 0   ;;  %s722_s19 = smov 0  }
   0x4   :  { %s724_s20 = smov 0   ;;  %s726_s21 = smov 0  }
   0x5 LB: > { %s741_s22 = sadd.s32 4294967295, %s684_s21   ;;  %s511_s23 = sadd.s32 4294967294, %s684_s21   ;;  %s684_s21 = sphi %s726_s21, %s905_s21   ;;  %s680_s20 = sphi %s724_s20, %s904_s20   ;;  %s676_s19 = sphi %s722_s19, %s903_s19   ;;  %s672_s18 = sphi %s720_s18, %s902_s18  }
   0x6   : > { %s745_s24 = sadd.s32 1, %s684_s21   ;;  %s28_s25 = sadd.s32 1, %s680_s20 }
   0x7   : > { %s25_s26 = ssub.s32 %s684_s21, %s745_s24  ;;  %p35_p0 = scmp.ne.s32.totalorder %s680_s20, %s676_s19 }
   0x8   : > { %p26_p1 = scmp.eq.s32.totalorder %s25_s26, 0  ;;  %p36_p2 = scmp.eq.s32.totalorder %s684_s21, 0 }
   0x9   : > { %p41_p3 = scmp.ne.s32.totalorder %s676_s19, %s672_s18  ;;  %p42_p4 = scmp.eq.s32.totalorder %s741_s22, 0 }
   0xa   : > { %s757_s27 = scalar_select %p26_p1, %s680_s20, %s28_s25  }
   0xb   : > { %p759_p5 = por %p36_p2, %p35_p0  ;;  %p763_p6 = por %p42_p4, %p41_p3 }
   0xc   : > { %p149_p7 = scmp.eq.s32.totalorder %s741_s22, 1  ;;  %p155_p8 = scmp.eq.s32.totalorder %s511_s23, 1 }
   0xd   : > { %s892_s29 = scalar_select %p763_p6, 1, 0 }
   0xe   : > { %p556_p10 = scmp.lt.s32.totalorder %s684_s21, 2  ;;  %p770_p11 = por %p149_p7, %p35_p0 }
   0xf   : > { %p774_p12 = por %p155_p8, %p41_p3  ;;  %s187_s7 = sand.u32 1, %s680_s20  }
  0x10   : > { %s893_s30 = scalar_select %p770_p11, 1, 0 }
  0x11   : > { %s894_s6 = scalar_select %p774_p12, 1, 0 }
  0x12   : > { %s528_s8 = sshll.u32 %s684_s21, 8  ;;  %s514_s9 = sshll.u32 %s187_s7, 4 }
  0x13   : > { %s783_s12 = scalar_lea.hbm %s883_s0, %s528_s8  ;;  %s191_s13 = scalar_lea.vmem [#allocation2], %s514_s9 }
  0x14   : > { %s199_s14 = sshll.u32 %s191_s13, 4  ;;  %p787_p13 = pnand %p556_p10, %p759_p5  ;;  %s791_s14 = int_to_ptr.vmem [resolvable:$true] %s199_s14 }
  0x15   : > { %s188_s16 = scalar_lea.sflag [#allocation3], %s187_s7  ;;  %s592_s17 = scalar_lea.hbm %s783_s12, 256 }
  0x16   : > { %p593_p2 = scmp.ne.s32.totalorder %s783_s12, %s592_s17  ;;  %p594_p3 = pneg %p787_p13 }
  0x17   : > { %s597_s26 = scalar_lea.hbm %s883_s0, 512  ;;  %p598_p5 = scmp.lt.s32.totalorder %s783_s12, %s883_s0 }
  0x18   : > { %p595_p4 = pnand %p594_p3, %p593_p2  ;;  %p599_p8 = scmp.lt.s32.totalorder %s597_s26, %s592_s17 }
  0x1a   : > { %p596_p7 = pneg %p595_p4  ;;  %p600_p10 = por %p599_p8, %p598_p5 }
  0x1c   : > { %p601_p9 = pnand %p600_p10, %p596_p7 }
  0x1e   : > { %604 = shalt.err (!%p601_p9)
}
  0x1f   : > { %s605_s7 = scalar_lea.vmem %s791_s14, 256  ;;  %s686_s9 = smov [#allocation2]  }
  0x20   : > { %p606_p0 = scmp.ne.s32.totalorder %s791_s14, %s605_s7  ;;  %s610_s10 = sshll.u32 %s686_s9, 4  ;;  %s611_s10 = int_to_ptr.vmem [resolvable:$false] %s610_s10 }
  0x21   : > { %s612_s11 = scalar_lea.vmem %s611_s10, 512  ;;  %p613_p4 = scmp.lt.s32.totalorder %s791_s14, %s611_s10 }
  0x22   : > { %p608_p1 = pnand %p606_p0, %p594_p3  ;;  %p614_p12 = scmp.lt.s32.totalorder %s612_s11, %s605_s7 }
  0x24   : > { %p609_p2 = pneg %p608_p1  ;;  %p615_p11 = por %p614_p12, %p613_p4 }
  0x26   : > { %p616_p6 = pnand %p615_p11, %p609_p2 }
  0x28   : > { %619 = shalt.err (!%p616_p6)
}
  0x29   : > { %551 = dma.hbm_to_vmem [thread:$0]  (!%p787_p13), %s783_s12, 256, %s791_s14, %s188_s16  }
  0x2a   : > { %p896_p9 = scmp.lt.s32.totalorder %s684_s21, 3  ;;  %p897_p7 = scmp.ge.s32.totalorder %s684_s21, 1 }
  0x2c   : > { %p205_p0 = pnand %p897_p7, %p896_p9 }
  0x2d   : > { %s818_s13 = sand.u32 (!%p205_p0), 1, %s676_s19   ;;  %p898_p6 = scmp.ne.s32.totalorder (!%p205_p0), %s892_s29, 0 }
  0x2e   : > { %208 = sbr.rel (%p205_p0) target bundleno = 729 (0x2d9), region = 40  ;;  %s518_s17 = sshll.u32 (!%p205_p0), %s818_s13, 4 }
  0x2f   : > { %s211_s23 = scalar_lea.sflag (!%p205_p0), [#allocation3], %s818_s13  ;;  %s214_s15 = scalar_lea.vmem (!%p205_p0), [#allocation2], %s518_s17 }
  0x33   : > { %663 = dma.done.wait (%p898_p6), %s211_s23, 256  }
  0x34   : > { %665 = vsyncadd (%p898_p6), %s211_s23, 4294967040  ;;  %v241_v0 = vld [vmem:[%s214_s15] sm:$0xff]  ;;  %v242_v1 = vld [vmem:[%s214_s15 + $0x8] sm:$0xff]  ;;  %v687_v3 = vmov 0.0   ;;  %vm688_vm0 = vmmov 0   ;;  %v251_v5 = vlaneseq  ;;  %vm257_vm1 = vcmask 64512  }
  0x35   : > { %v243_v2 = vadd.f32 %v242_v1, %v241_v0  ;;  %534 = vmatprep.subr.mxu0 %v687_v3  ;;  %v248_v4 = vld [vmem:[%s884_s1] sm:$0xff]  ;;  %539 = vmatprep.subr.mxu1 %v687_v3  ;;  %vm337_vm2 = vcmask 1041408   ;;  %vm333_vm3 = vcmask 15360   ;;  %s529_s7 = sshll.u32 %s741_s22, 8  ;;  %s240_s9 = scalar_lea.vmem [#allocation5], %s518_s17 }
  0x36   : > { %535 = vmatpush3.msra.mxu0 %v248_v4  ;;  %536 = vmatprep.mubr.msk.f32.mxu0 %vm688_vm0, %v687_v3  ;;  %v252_v6 = vand.u32 127, %v251_v5  ;;  %v254_v7 = vshrl.u32 %v251_v5, 7  ;;  %v331_v12 = vld [vmem:[%s886_s3] sm:$0x3]  ;;  %s441_s10 = sshll.u32 %s240_s9, 4  ;;  %s846_s15 = scalar_lea.hbm %s888_s5, %s529_s7  ;;  %s442_s10 = int_to_ptr.vmem [resolvable:$true] %s441_s10 }
  0x37   : > { %244 = vadd.xlane.f32.xlu0 %v243_v2  ;;  %541 = vmatprep.mubr.msk.f32.mxu1 %vm688_vm0, %v687_v3  ;;  %v249_v13 = vld [vmem:[%s885_s2] sm:$0x1]  ;;  %s427_s12 = scalar_lea.sflag [#allocation4], %s818_s13  ;;  %s620_s14 = scalar_lea.vmem %s442_s10, 256 }
  0x38   : > { %v255_v8 = vsub.s32 %v252_v6, %v254_v7  ;;  %540 = vmatpush3.msk.msra.mxu1 %vm337_vm2, %v331_v12  ;;  %v332_v18 = vld [vmem:[%s887_s4] sm:$0x1]  ;;  %v417_v25 = vsub.s32 0, %v254_v7  ;;  %p621_p11 = scmp.ne.s32.totalorder %s442_s10, %s620_s14  ;;  %p899_p12 = scmp.ne.s32.totalorder %s893_s30, 0 }
  0x39   : > { %s689_s22 = smov [#allocation5]  }
  0x3a   : > { %p622_p13 = pnand %p621_p11, %p899_p12  ;;  %s624_s17 = sshll.u32 %s689_s22, 4  ;;  %s625_s17 = int_to_ptr.vmem [resolvable:$false] %s624_s17 }
  0x3b   : > { %s626_s29 = scalar_lea.vmem %s625_s17, 512  ;;  %p627_p3 = scmp.lt.s32.totalorder %s442_s10, %s625_s17 }
  0x3c   : > { %p623_p1 = pneg %p622_p13  ;;  %p628_p5 = scmp.lt.s32.totalorder %s626_s29, %s620_s14 }
  0x3e   : > { %p629_p8 = por %p628_p5, %p627_p3 }
  0x40   : > { %p630_p10 = pnand %p629_p8, %p623_p1 }
  0xc0   : > { %v245_v9 = vpop.xlane.xlu0 %244 }
  0xc1   : > { %v247_v10 = vmul.f32 0.00390625, %v245_v9 }
  0xc3   : > { %v256_v11 = vrot.slane %v247_v10, %v255_v8 }
  0xc5   : > { %537 = vmatmul.mubr.msk.f32.vlgmr.msra.gmra.mxu0 %vm257_vm1, %v256_v11 }
 0x185   : > { %v326_v14 = vpop.f32.mrf.mxu0 }
 0x186   : > { %v327_v15 = vadd.f32 %v326_v14, %v249_v13 }
 0x187   : > { %v538_v16 = vpop.f32.mrf.mxu0 }
 0x188   : > { %v330_v17 = vmax.f32 %v327_v15, 0.0 }
 0x18a   : > { %542 = vmatmul.mubr.msk.f32.vlgmr.msra.gmra.mxu1 %vm333_vm3, %v330_v17 }
 0x24a   : > { %v407_v19 = vpop.f32.mrf.mxu1 }
 0x24b   : > { %v408_v20 = vadd.f32 %v407_v19, %v332_v18 }
 0x24c   : > { %v543_v21 = vpop.f32.mrf.mxu1 }
 0x24d   : > { %v411_v22 = vmul.f32 0.16666667, %v408_v20 }
 0x24f   : > { %v412_v23 = vadd.f32 0.5, %v411_v22 }
 0x251   : > { %v413_v24 = vmax.f32 %v412_v23, 0.0 }
 0x253   : > { %v414_v26 = vmin.f32 %v413_v24, 1.0 }
 0x255   : > { %v418_v27 = vrot.slane %v414_v26, %v417_v25 }
 0x257   : > { %420 = vbcast.lane.b32.xlu0 %v418_v27, 256 }
 0x2c9   : > { %v421_v28 = vpop.permute.xlu0 %420 }
 0x2ca   : > { %v422_v29 = vmul.f32 %v421_v28, %v241_v0  ;;  %v423_v30 = vmul.f32 %v421_v28, %v242_v1 }
 0x2cc   : > { %424 = vst [vmem:[%s240_s9] sm:$0xff] %v422_v29  ;;  %425 = vst [vmem:[%s240_s9 + $0x8] sm:$0xff] %v423_v30 }
 0x2cd   : > { %633 = shalt.err (!%p630_p10)
}
 0x2ce   : > { %s634_s16 = scalar_lea.hbm %s846_s15, 256  ;;  %s638_s26 = scalar_lea.hbm %s888_s5, 512 }
 0x2cf   : > { %p635_p2 = scmp.ne.s32.totalorder %s846_s15, %s634_s16  ;;  %p639_p7 = scmp.lt.s32.totalorder %s846_s15, %s888_s5 }
 0x2d0   : > { %p640_p0 = scmp.lt.s32.totalorder %s638_s26, %s634_s16 }
 0x2d1   : > { %p636_p4 = pnand %p635_p2, %p899_p12 }
 0x2d2   : > { %p641_p6 = por %p640_p0, %p639_p7 }
 0x2d3   : > { %p637_p9 = pneg %p636_p4 }
 0x2d5   : > { %p642_p11 = pnand %p641_p6, %p637_p9 }
 0x2d7   : > { %645 = shalt.err (!%p642_p11)
}
 0x2d8   : > { %546 = dma.vmem_to_hbm [thread:$0]  (%p899_p12), %s442_s10, 256, %s846_s15, %s427_s12  }
 0x2d9 PF: > { %s453_s7 = sand.u32 1, %s672_s18   ;;  %p900_p13 = scmp.ne.s32.totalorder %s894_s6, 0 }
 0x2da   : > { %p901_p1 = scmp.ge.s32.totalorder %s684_s21, 2  ;;  %s454_s9 = scalar_lea.sflag [#allocation4], %s453_s7 }
 0x2dc   : > { %p553_p3 = pnand %p901_p1, %p900_p13 }
 0x2de   : > { %p554_p5 = pneg %p553_p3 }
 0x2e0   : > { %667 = dma.done.wait (%p554_p5), %s454_s9, 256  }
 0x2e1   : > { %669 = vsyncadd (%p554_p5), %s454_s9, 4294967040  ;;  %p18_p8 = scmp.ge.s32.totalorder %s745_s24, 4   ;;  %s902_s18 = smov %s676_s19 }
 0x2e2   : > { %s903_s19 = smov %s680_s20  ;;  %s904_s20 = smov %s757_s27 }
 0x2e3   : > { %s905_s21 = smov %s745_s24  ;;  %20 = sbr.rel (!%p18_p8) target bundleno = 5 (0x5), region = 85 }
 0x2e8   :  { %459 = vsyncpa [#allocation3], 1 }
 0x2e9   :  { %461 = vsyncpa [#allocation3 + $0x1], 1 }
 0x2ea   :  { %462 = vsyncpa [#allocation4], 1 }
 0x2eb   :  { %464 = vsyncpa [#allocation4 + $0x1], 1 }

</bundles_post_ra>
